<compile_context>
chip_gen: v7x
topology: tpu7x:2x2x1
jax: 0.10.0
libtpu: 0.0.40
codegen_flags: <defaults>
</compile_context>

<pallas_src>
import math

import jax
import jax.numpy as jnp
import numpy as np
from jax.experimental import pallas as pl
from jax.experimental.pallas import tpu as pltpu


def _round_up(v, m):
    return ((v + m - 1) // m) * m


# ----------------------------------------------------------------------------
# FRFT constants (plain JAX glue, computed once like the module's buffers)
# ----------------------------------------------------------------------------
def dfrtmtrx(N, a):
    """FRFT matrix matching the PyTorch dfrtmtrx for even N.

    For even N the torch einsum ('ij,jk,ni->nk' with Evec = I) reduces to
    sqrt(N) * diag(exp(-i*pi/2*a*l)).  (The odd-N branch of the PyTorch code
    produces mismatched einsum dims and errors there as well.)
    """
    assert N % 2 == 0, "even N only (odd N errors in the PyTorch reference too)"
    l = jnp.arange(N, dtype=jnp.float32)
    f = jnp.exp(-1j * (math.pi / 2.0) * a * l).astype(jnp.complex64)
    return (N ** 0.5) * jnp.diag(f)


def make_modulation(H, W, order):
    """Fold both fftshifts into one complex modulation plane.

    FRFT2D(x) = fftshift(fftshift(x) * M) with M[h,w] = h_test[h,w]*w_test[w,h].
    For even H == W, fftshift is an involutive permutation that distributes
    over elementwise products, so FRFT2D(x) = x * fftshift(M) exactly.
    Returns Re/Im of fftshift(M) as (H, W) float32 planes plus the dense
    matrices (used only by the pure-JAX reference check).
    """
    assert H == W, "h_test * w_test.T requires H == W (hard contract, as in PyTorch)"
    assert H % 2 == 0 and W % 2 == 0, "even H, W required"
    h_test = dfrtmtrx(H, order)                 # (H, H) complex64 (diagonal)
    w_test = dfrtmtrx(W, order)                 # (W, W) complex64 (diagonal)
    M = h_test * w_test.T                       # elementwise product
    Ms = jnp.fft.fftshift(M, axes=(0, 1))       # (H, W) complex64
    return (jnp.real(Ms).astype(jnp.float32),
            jnp.imag(Ms).astype(jnp.float32),
            h_test, w_test)


# ----------------------------------------------------------------------------
# Pallas kernel: channel attention + per-channel scale on (Nb, C, H*W) blocks
# ----------------------------------------------------------------------------
def attn_scale_kernel(x_ref, w1t_ref, b1_ref, w2t_ref, b2_ref, y_ref):
    # x_ref: (Nb, C, HW) f32 -- spatial flattened onto the lane axis.
    x = x_ref[...]

    # global average pool over spatial (lane reduce) -> (Nb, C)
    pooled = jnp.mean(x, axis=2)

    # 1x1 conv C -> Cr (+bias) + ReLU   (tiny matmul -> MXU, otherwise idle)
    hid = jnp.dot(pooled, w1t_ref[...],
                  preferred_element_type=jnp.float32) + b1_ref[...]
    hid = jnp.maximum(hid, 0.0)                           # (Nb, Cr_pad)

    # 1x1 conv Cr -> C (+bias) + sigmoid
    att = jnp.dot(hid, w2t_ref[...],
                  preferred_element_type=jnp.float32) + b2_ref[...]
    att = jax.nn.sigmoid(att)                             # (Nb, C)

    # per-(n, c) scale: sublane-row scale broadcast over the lane axis
    y_ref[...] = x * att[:, :, None]


def frft_forward(x_nchw, w1, b1, w2, b2, m_re, m_im):
    """x_nchw (N,C,H,W) f32 -> (N,C,H,W) complex64, matching the PyTorch module."""
    N, C, H, W = x_nchw.shape
    assert H == W and H % 2 == 0 and W % 2 == 0, "square, even spatial dims required"
    HW = H * W
    Cr = w1.shape[0]
    Cr_pad = _round_up(max(Cr, 8), 8)

    x_flat = x_nchw.reshape(N, C, HW).astype(jnp.float32)

    # Pad the hidden dim to >= 8.  Exact no-op: padded units have zero weight
    # and zero bias, relu(0) = 0, and the corresponding rows of w2.T are zero.
    w1t = jnp.zeros((C, Cr_pad), jnp.float32).at[:, :Cr].set(jnp.transpose(w1))
    b1p = jnp.zeros((1, Cr_pad), jnp.float32).at[:, :Cr].set(b1.reshape(1, Cr))
    w2t = jnp.zeros((Cr_pad, C), jnp.float32).at[:Cr, :].set(jnp.transpose(w2))
    b2r = b2.reshape(1, C)

    # ---- generation-aware batch blocking -----------------------------------
    try:
        vmem_phys = int(pltpu.get_tpu_info().vmem_capacity_bytes)
    except Exception:
        vmem_phys = 64 << 20                       # conservative (v7x-class)
    small_vmem = vmem_phys <= (80 << 20)           # v7x: 64 MiB/TC, 2 TCs/chip
    budget = (12 << 20) if small_vmem else (28 << 20)   # per-step live bytes
    vmem_limit = (40 << 20) if small_vmem else (100 << 20)

    # Per-sample VMEM footprint: one input + one output f32 block row; the C
    # axis is the sublane (second-minor) dim and is padded to a multiple of 8.
    # TODO(synk): C % 8 != 0 still costs up to 2x VMEM padding / masked sublane
    # stores; realistic channel counts (multiples of 8) avoid it entirely.
    C_pad = _round_up(C, 8)
    bytes_per_n = 2 * C_pad * HW * 4
    nb_cap = max(1, budget // bytes_per_n)
    if small_vmem and N >= 2:
        nb_cap = min(nb_cap, (N + 1) // 2)         # keep >= 2 grid steps (2 TCs)
    Nb = int(max(1, min(nb_cap, N)))
    grid = (pl.cdiv(N, Nb),)                       # ragged last block is masked

    headroom = vmem_phys - (8 << 20)
    needed = 2 * Nb * bytes_per_n + (2 << 20)      # double-buffered blocks + slack
    if needed > headroom:
        # TODO(synk): add a second grid axis over HW (pool pass + scale pass)
        # for samples whose C*H*W footprint exceeds VMEM even at Nb = 1.
        raise ValueError(
            f"FRFT kernel: one sample needs ~{needed >> 20} MiB VMEM "
            f"(> {headroom >> 20} MiB available); spatial blocking not implemented.")
    vmem_limit = int(min(max(vmem_limit, needed), headroom))

    y = pl.pallas_call(
        attn_scale_kernel,
        out_shape=jax.ShapeDtypeStruct((N, C, HW), jnp.float32),
        grid_spec=pltpu.PrefetchScalarGridSpec(
            num_scalar_prefetch=0,
            grid=grid,
            in_specs=[
                pl.BlockSpec((Nb, C, HW), lambda n: (n, 0, 0)),   # x
                pl.BlockSpec((C, Cr_pad), lambda n: (0, 0)),      # w1.T (padded)
                pl.BlockSpec((1, Cr_pad), lambda n: (0, 0)),      # b1
                pl.BlockSpec((Cr_pad, C), lambda n: (0, 0)),      # w2.T (padded)
                pl.BlockSpec((1, C), lambda n: (0, 0)),           # b2
            ],
            out_specs=pl.BlockSpec((Nb, C, HW), lambda n: (n, 0, 0)),
        ),
        compiler_params=pltpu.CompilerParams(
            dimension_semantics=("parallel",),
            vmem_limit_bytes=vmem_limit,
        ),
    )(x_flat, w1t, b1p, w2t, b2r)

    # complex64 cannot be written from a Mosaic kernel and f32->complex64
    # bitcast is rejected by XLA, so one XLA elementwise pass is unavoidable.
    # Fold the diagonal FRFT modulation into that pass (single fused op that
    # reads y once and writes the complex64 result once).
    y4 = y.reshape(N, C, H, W)
    return jax.lax.complex(y4 * m_re, y4 * m_im)


# ----------------------------------------------------------------------------
# Pure-JAX reference mirroring the PyTorch forward (f32).
# TODO(synk): torch.autocast fp16 of the attention convs is approximated in f32.
# ----------------------------------------------------------------------------
def reference_forward(x, w1, b1, w2, b2, h_test, w_test):
    pooled = jnp.mean(x, axis=(2, 3))                         # (N, C)
    hid = jax.nn.relu(pooled @ jnp.transpose(w1) + b1)        # (N, Cr)
    att = jax.nn.sigmoid(hid @ jnp.transpose(w2) + b2)        # (N, C)
    xa = x * att[:, :, None, None]
    xs = jnp.fft.fftshift(xa.astype(jnp.complex64), axes=(2, 3))
    out = xs * h_test[None, None, :, :]                       # 'nchw,nhw->nchw'
    out = out * jnp.transpose(w_test)[None, None, :, :]       # 'nchw,nwh->nchw'
    return jnp.fft.fftshift(out, axes=(2, 3))


# ----------------------------------------------------------------------------
if __name__ == "__main__":
    N, C, H, W = 2, 4, 16, 16          # in_channels >= 3, even square spatial
    reduction_ratio = 16
    Cr = max(C // reduction_ratio, 1)

    key = jax.random.PRNGKey(0)
    kx, k1, k2, k3, k4, k5 = jax.random.split(key, 6)

    x = jax.random.normal(kx, (N, C, H, W), jnp.float32)

    # parameter shapes follow the 1x1 nn.Conv2d weights, squeezed
    w1 = 0.2 * jax.random.normal(k1, (Cr, C), jnp.float32)    # Conv2d(C, Cr, 1)
    b1 = 0.1 * jax.random.normal(k2, (Cr,), jnp.float32)
    w2 = 0.2 * jax.random.normal(k3, (C, Cr), jnp.float32)    # Conv2d(Cr, C, 1)
    b2 = 0.1 * jax.random.normal(k4, (C,), jnp.float32)
    order = jax.nn.sigmoid(jax.random.normal(k5, (1,), jnp.float32))[0]

    m_re, m_im, h_test, w_test = make_modulation(H, W, order)

    out = jax.jit(frft_forward)(x, w1, b1, w2, b2, m_re, m_im)
    out = jax.block_until_ready(out)

    ref = reference_forward(x, w1, b1, w2, b2, h_test, w_test)
    np.testing.assert_allclose(np.asarray(out), np.asarray(ref),
                               rtol=2e-3, atol=2e-3)
    assert out.shape == (N, C, H, W) and out.dtype == jnp.complex64

    print("KERNEL_OK")
</pallas_src>

<mosaic_0001>
module attributes {stable_mosaic.version = 11 : i64} {
  func.func @attn_scale_kernel(%arg0: i32, %arg1: memref<1x4x256xf32, #tpu.memory_space<vmem>>, %arg2: memref<4x8xf32, #tpu.memory_space<vmem>>, %arg3: memref<1x8xf32, #tpu.memory_space<vmem>>, %arg4: memref<8x4xf32, #tpu.memory_space<vmem>>, %arg5: memref<1x4xf32, #tpu.memory_space<vmem>>, %arg6: memref<1x4x256xf32, #tpu.memory_space<vmem>>) attributes {dimension_semantics = [#tpu.dimension_semantics<parallel>], iteration_bounds = array<i64: 2>, scalar_prefetch = 0 : i64, scratch_operands = 0 : i64, tpu.core_type = #tpu.core_type<tc>, window_params = [{transform_indices = @transform_0, window_bounds = array<i64: 1, 4, 256>}, {pipeline_mode = #tpu.pipeline_mode<synchronous>, transform_indices = @transform_1, window_bounds = array<i64: 4, 8>}, {pipeline_mode = #tpu.pipeline_mode<synchronous>, transform_indices = @transform_2, window_bounds = array<i64: 1, 8>}, {pipeline_mode = #tpu.pipeline_mode<synchronous>, transform_indices = @transform_3, window_bounds = array<i64: 8, 4>}, {pipeline_mode = #tpu.pipeline_mode<synchronous>, transform_indices = @transform_4, window_bounds = array<i64: 1, 4>}, {transform_indices = @transform_5, window_bounds = array<i64: 1, 4, 256>}]} {
    %c0 = arith.constant 0 : index
    %c0_0 = arith.constant 0 : index
    %c0_1 = arith.constant 0 : index
    %0 = vector.load %arg1[%c0, %c0_0, %c0_1] : memref<1x4x256xf32, #tpu.memory_space<vmem>>, vector<1x4x256xf32>
    %cst = arith.constant dense<0.000000e+00> : vector<1x4xf32>
    %1 = vector.multi_reduction <add>, %0, %cst [2] : vector<1x4x256xf32> to vector<1x4xf32>
    %cst_2 = arith.constant 2.560000e+02 : f32
    %2 = vector.broadcast %cst_2 : f32 to vector<1x4xf32>
    %3 = arith.divf %1, %2 : vector<1x4xf32>
    %c0_3 = arith.constant 0 : index
    %c0_4 = arith.constant 0 : index
    %4 = vector.load %arg2[%c0_3, %c0_4] : memref<4x8xf32, #tpu.memory_space<vmem>>, vector<4x8xf32>
    %cst_5 = arith.constant dense<0.000000e+00> : vector<1x8xf32>
    %5 = tpu.matmul %3, %4, %cst_5 {dimension_numbers = #tpu.dot_dimension_numbers<[1], [0], [0], [1], [0, 0, 1, 1], [], []>} : vector<1x4xf32>, vector<4x8xf32>, vector<1x8xf32> -> vector<1x8xf32>
    %c0_6 = arith.constant 0 : index
    %c0_7 = arith.constant 0 : index
    %6 = vector.load %arg3[%c0_6, %c0_7] : memref<1x8xf32, #tpu.memory_space<vmem>>, vector<1x8xf32>
    %7 = arith.addf %5, %6 : vector<1x8xf32>
    %cst_8 = arith.constant 0.000000e+00 : f32
    %8 = vector.broadcast %cst_8 : f32 to vector<1x8xf32>
    %9 = arith.maximumf %7, %8 : vector<1x8xf32>
    %c0_9 = arith.constant 0 : index
    %c0_10 = arith.constant 0 : index
    %10 = vector.load %arg4[%c0_9, %c0_10] : memref<8x4xf32, #tpu.memory_space<vmem>>, vector<8x4xf32>
    %cst_11 = arith.constant dense<0.000000e+00> : vector<1x4xf32>
    %11 = tpu.matmul %9, %10, %cst_11 {dimension_numbers = #tpu.dot_dimension_numbers<[1], [0], [0], [1], [0, 0, 1, 1], [], []>} : vector<1x8xf32>, vector<8x4xf32>, vector<1x4xf32> -> vector<1x4xf32>
    %c0_12 = arith.constant 0 : index
    %c0_13 = arith.constant 0 : index
    %12 = vector.load %arg5[%c0_12, %c0_13] : memref<1x4xf32, #tpu.memory_space<vmem>>, vector<1x4xf32>
    %13 = arith.addf %11, %12 : vector<1x4xf32>
    %14 = arith.negf %13 : vector<1x4xf32>
    %15 = math.exp %14 : vector<1x4xf32>
    %cst_14 = arith.constant 1.000000e+00 : f32
    %16 = vector.broadcast %cst_14 : f32 to vector<1x4xf32>
    %17 = arith.addf %16, %15 : vector<1x4xf32>
    %18 = arith.divf %16, %17 : vector<1x4xf32>
    %19 = vector.shape_cast %18 : vector<1x4xf32> to vector<1x4x1xf32>
    %20 = vector.broadcast %19 : vector<1x4x1xf32> to vector<1x4x256xf32>
    %21 = arith.mulf %0, %20 : vector<1x4x256xf32>
    %c0_15 = arith.constant 0 : index
    %c0_16 = arith.constant 0 : index
    %c0_17 = arith.constant 0 : index
    %22 = vector.load %arg6[%c0_15, %c0_16, %c0_17] : memref<1x4x256xf32, #tpu.memory_space<vmem>>, vector<1x4x256xf32>
    tpu.vector_store %arg6[%c0_15, %c0_16, %c0_17], %21 {strides = array<i32>} : memref<1x4x256xf32, #tpu.memory_space<vmem>>, vector<1x4x256xf32>,
    return
  }
  func.func @transform_0(%arg0: i32) -> (i32, i32, i32) {
    %c0_i32 = arith.constant 0 : i32
    %c0_i32_0 = arith.constant 0 : i32
    %c0_i32_1 = arith.constant 0 : i32
    return %arg0, %c0_i32, %c0_i32_0 : i32, i32, i32
  }
  func.func @transform_1(%arg0: i32) -> (i32, i32) {
    %c0_i32 = arith.constant 0 : i32
    %c0_i32_0 = arith.constant 0 : i32
    %c0_i32_1 = arith.constant 0 : i32
    return %c0_i32, %c0_i32_0 : i32, i32
  }
  func.func @transform_2(%arg0: i32) -> (i32, i32) {
    %c0_i32 = arith.constant 0 : i32
    %c0_i32_0 = arith.constant 0 : i32
    %c0_i32_1 = arith.constant 0 : i32
    return %c0_i32, %c0_i32_0 : i32, i32
  }
  func.func @transform_3(%arg0: i32) -> (i32, i32) {
    %c0_i32 = arith.constant 0 : i32
    %c0_i32_0 = arith.constant 0 : i32
    %c0_i32_1 = arith.constant 0 : i32
    return %c0_i32, %c0_i32_0 : i32, i32
  }
  func.func @transform_4(%arg0: i32) -> (i32, i32) {
    %c0_i32 = arith.constant 0 : i32
    %c0_i32_0 = arith.constant 0 : i32
    %c0_i32_1 = arith.constant 0 : i32
    return %c0_i32, %c0_i32_0 : i32, i32
  }
  func.func @transform_5(%arg0: i32) -> (i32, i32, i32) {
    %c0_i32 = arith.constant 0 : i32
    %c0_i32_0 = arith.constant 0 : i32
    %c0_i32_1 = arith.constant 0 : i32
    return %arg0, %c0_i32, %c0_i32_0 : i32, i32, i32
  }
}

</mosaic_0001>

<bundles_post_ra>
// kernel: custom-call
= control target key start
LH: loop header
LB: loop body
LE: loop exit
PB: predicated region body
PF: predicated region fallthrough
CT: control target
= control target key end

     0   :  { %s126_s0 = inlined_call_operand.vmem [shape: f32[2,4,16,16], index: 0, kind: input, shape index: {}]   ;;  %s127_s1 = inlined_call_operand.vmem [shape: f32[2,4,16,16], index: 1, kind: input, shape index: {}]   ;;  %s128_s2 = inlined_call_operand.hbm [shape: c64[2,4,16,16], index: 2, kind: output, shape index: {}]  }
   0x1   :  { %s87_s11 = scalar_lea.hbm %s128_s2, 2048 }
   0x2   :  { %4 = vsyncpa [#allocation0], 0  ;;  %s5_s14 = sshll.u32 %s126_s0, 4  ;;  %s6_s14 = int_to_ptr.vmem [resolvable:$true] %s5_s14 }
   0x3   :  { %s18_s15 = scalar_lea.vmem %s6_s14, 2048  ;;  %p23_p1 = scmp.lt.s32.totalorder %s6_s14, %s6_s14 }
   0x4   :  { %p19_p0 = scmp.ne.s32.totalorder %s6_s14, %s18_s15  ;;  %p24_p2 = scmp.lt.s32.totalorder %s18_s15, %s18_s15 }
   0x6   :  { %p25_p3 = por %p24_p2, %p23_p1 }
   0x8   :  { %p26_p4 = pnand %p25_p3, %p19_p0 }
   0xa   :  { %29 = shalt.err (!%p26_p4)  }
   0xb   :  { %p31_p5 = scmp.ne.s32.totalorder %s128_s2, %s87_s11  ;;  %s32_s0 = scalar_lea.hbm %s128_s2, 4096 }
   0xc   :  { %p33_p6 = scmp.lt.u32.totalorder %s32_s0, %s87_s11  ;;  %p34_p7 = scmp.lt.u32.totalorder %s87_s11, %s128_s2 }
   0xe   :  { %p35_p8 = por %p34_p7, %p33_p6 }
  0x10   :  { %p36_p9 = pnand %p35_p8, %p31_p5 }
  0x12   :  { %39 = shalt.err (!%p36_p9)  }
  0x13   :  { %8 = dma.vmem_to_hbm [thread:$0]  %s6_s14, 2048, %s128_s2, [#allocation0] }
  0x14   :  { %65 = dma.done.wait [#allocation0], 2048  }
  0x15   :  { %66 = vsyncadd [#allocation0], 4294965248 }
  0x16   :  { %10 = vsyncpa [#allocation0], 1 }
  0x17   :  { %11 = vsyncpa [#allocation1], 0  ;;  %s12_s28 = sshll.u32 %s127_s1, 4  ;;  %s13_s28 = int_to_ptr.vmem [resolvable:$true] %s12_s28 }
  0x18   :  { %s40_s29 = scalar_lea.vmem %s13_s28, 2048  ;;  %p45_p11 = scmp.lt.s32.totalorder %s13_s28, %s13_s28 }
  0x19   :  { %p41_p10 = scmp.ne.s32.totalorder %s13_s28, %s40_s29  ;;  %p46_p12 = scmp.lt.s32.totalorder %s40_s29, %s40_s29 }
  0x1b   :  { %p47_p13 = por %p46_p12, %p45_p11 }
  0x1d   :  { %p48_p0 = pnand %p47_p13, %p41_p10 }
  0x1f   :  { %51 = shalt.err (!%p48_p0)  }
  0x20   :  { %p53_p1 = scmp.ne.s32.totalorder %s87_s11, %s32_s0  ;;  %p56_p2 = scmp.lt.u32.totalorder %s32_s0, %s32_s0 }
  0x22   :  { %p57_p3 = por %p56_p2, %p34_p7 }
  0x24   :  { %p59_p4 = por %p57_p3, %p33_p6 }
  0x26   :  { %p60_p5 = pnand %p59_p4, %p53_p1 }
  0x28   :  { %63 = shalt.err (!%p60_p5)  }
  0x29   :  { %15 = dma.vmem_to_hbm [thread:$0]  %s13_s28, 2048, %s87_s11, [#allocation1] }
  0x2a   :  { %67 = dma.done.wait [#allocation1], 2048  }
  0x2b   :  { %68 = vsyncadd [#allocation1], 4294965248 }
  0x2c   :  { %17 = vsyncpa [#allocation1], 1 }

// kernel: frft_forward.1
= control target key start
LH: loop header
LB: loop body
LE: loop exit
PB: predicated region body
PF: predicated region fallthrough
CT: control target
= control target key end

     0   :  { %s566_s18 = smov 0   ;;  %s602_s0 = inlined_call_operand.vmem [shape: f32[2,4,256], index: 0, kind: input, shape index: {}]   ;;  %s603_s1 = inlined_call_operand.vmem [shape: f32[4,8], index: 1, kind: input, shape index: {}]   ;;  %s604_s2 = inlined_call_operand.vmem [shape: f32[1,8], index: 2, kind: input, shape index: {}]   ;;  %s605_s3 = inlined_call_operand.vmem [shape: f32[8,4], index: 3, kind: input, shape index: {}]   ;;  %s606_s4 = inlined_call_operand.vmem [shape: f32[1,4], index: 4, kind: input, shape index: {}]   ;;  %s607_s5 = inlined_call_operand.vmem [shape: f32[2,4,256], index: 5, kind: output, shape index: {}]  }
   0x1 LB: > { %s478_s19 = sadd.s32 4294967295, %s531_s18   ;;  %p482_p0 = scmp.ge.s32.totalorder %s531_s18, 1  ;;  %s531_s18 = sphi %s566_s18, %s15_s18  }
   0x2   : > { %p187_p1 = scmp.lt.s32.totalorder %s531_s18, 3 }
   0x4   : > { %p188_p2 = pnand %p482_p0, %p187_p1 }
   0x5   : > { %p215_p3 = scmp.lt.s32.totalorder (!%p188_p2), %s478_s19, 1  ;;  %vm229_vm0 = vcmask (!%p188_p2), 1043456   ;;  %v533_v5 = vmov (!%p188_p2), 0.0   ;;  %v237_v6 = vld [vmem:[%s603_s1] sm:$0xf] (!%p188_p2)  ;;  %vm534_vm1 = vmmov (!%p188_p2), 0   ;;  %v240_v7 = vlaneseq (!%p188_p2) }
   0x6   : > { %191 = sbr.rel (%p188_p2) target bundleno = 746 (0x2ea), region = 40  ;;  %499 = vmatprep.subr.mxu0 (!%p188_p2), %v533_v5  ;;  %504 = vmatprep.subr.mxu1 (!%p188_p2), %v533_v5  ;;  %vm246_vm2 = vcmask (!%p188_p2), 31744   ;;  %v323_v14 = vld [vmem:[%s605_s3] sm:$0xff] (!%p188_p2)  ;;  %vm325_vm3 = vcmask (!%p188_p2), 64512   ;;  %v535_v30 = vmov (!%p188_p2), 839922192  }
   0x7   : > { %500 = vmatpush3.msk.msra.mxu0 (!%p188_p2), %vm229_vm0, %v237_v6  ;;  %501 = vmatprep.mubr.msk.f32.mxu0 (!%p188_p2), %vm534_vm1, %v533_v5  ;;  %v241_v8 = vand.u32 (!%p188_p2), 127, %v240_v7  ;;  %v243_v9 = vshrl.u32 (!%p188_p2), %v240_v7, 7  ;;  %v238_v15 = vld [vmem:[%s604_s2] sm:$0x1] (!%p188_p2)  ;;  %v414_v31 = vunpack.c.l.s4 (!%p188_p2), %v535_v30 }
   0x8   : > { %506 = vmatprep.mubr.msk.f32.mxu1 (!%p188_p2), %vm534_vm1, %v533_v5  ;;  %505 = vmatpush3.msra.mxu1 (!%p188_p2), %v323_v14  ;;  %v324_v20 = vld [vmem:[%s606_s4] sm:$0x1] (!%p188_p2) }
   0x9   : > { %v244_v10 = vsub.s32 (!%p188_p2), %v241_v8, %v243_v9  ;;  %v407_v27 = vsub.s32 (!%p188_p2), 0, %v243_v9  ;;  %v415_v32 = vunpack.c.0.s8 (!%p188_p2), %v414_v31 }
   0xb   : > { %v418_v33 = vsub.s32 (!%p188_p2), %v415_v32, %v243_v9 }
   0xd   : > { %s609_s19 = smov (!%p215_p3, %s478_s19), 1 }
   0xe   : > { %s493_s20 = sshll.u32 %s609_s19, 3 }
   0xf   : > { %s219_s23 = scalar_lea.vmem %s602_s0, %s493_s20  ;;  %s224_s9 = scalar_lea.vmem %s607_s5, %s493_s20 }
  0x10   : > { %v225_v0 = vld [vmem:[%s219_s23] sm:$0xff] }
  0x11   : > { %v227_v1 = vcombine.high %v225_v0, %v225_v0  ;;  %v230_v2 = vsel %vm229_vm0, %v225_v0, 0.0 }
  0x13   : > { %v231_v3 = vsel %vm229_vm0, %v227_v1, 0.0 }
  0x14   : > { %v232_v4 = vadd.f32 %v231_v3, %v230_v2 }
  0x16   : > { %233 = vadd.xlane.f32.xlu0 %v232_v4 }
  0xa3   : > { %v234_v11 = vpop.xlane.xlu0 %233 }
  0xa4   : > { %v236_v12 = vmul.f32 0.00390625, %v234_v11 }
  0xa6   : > { %v245_v13 = vrot.slane %v236_v12, %v244_v10 }
  0xa8   : > { %502 = vmatmul.mubr.msk.f32.vlgmr.msra.gmra.mrb[0].mxu0 %vm246_vm2, %v245_v13 }
 0x17b   : > { %v318_v16 = vpop.f32.mrb[0].mxu0 }
 0x17c   : > { %v319_v17 = vadd.f32 %v318_v16, %v238_v15  ;;  %v503_v18 = vpop.f32.mrb[1].mxu0 }
 0x17e   : > { %v322_v19 = vmax.f32 %v319_v17, 0.0 }
 0x180   : > { %507 = vmatmul.mubr.msk.f32.vlgmr.msra.gmra.mrb[0].mxu1 %vm325_vm3, %v322_v19 }
 0x253   : > { %v395_v21 = vpop.f32.mrb[0].mxu1 }
 0x254   : > { %v396_v22 = vadd.f32 %v395_v21, %v324_v20  ;;  %v508_v23 = vpop.f32.mrb[1].mxu1 }
 0x256   : > { %v490_v24 = vmul.f32 -1.442695, %v396_v22 }
 0x258   : > { %521 = vpow2.f32 %v490_v24 }
 0x262   : > { %v522_v25 = vpop.eup %521 }
 0x263   : > { %v402_v26 = vadd.f32 1.0, %v522_v25 }
 0x265   : > { %523 = vrcp.f32 %v402_v26 }
 0x26f   : > { %v524_v28 = vpop.eup %523 }
 0x270   : > { %v408_v29 = vrot.slane %v524_v28, %v407_v27 }
 0x272   : > { %410 = vbcast.lane.b32.xlu0 %v408_v29, 256 }
 0x2e4   : > { %v411_v34 = vpop.permute.xlu0 %410 }
 0x2e5   : > { %v419_v35 = vrot.slane %v411_v34, %v418_v33 }
 0x2e7   : > { %v421_v36 = vmul.f32 %v419_v35, %v225_v0 }
 0x2e9   : > { %422 = vst [vmem:[%s224_s9] sm:$0xff] %v421_v36 }
 0x2ea PF: > { %s15_s18 = sadd.s32 1, %s531_s18  }
 0x2eb   : > { %p12_p4 = scmp.ge.s32.totalorder %s15_s18, 4  }
 0x2ed   :  { %14 = sbr.rel (!%p12_p4) target bundleno = 1 (0x1), region = 70 }

</bundles_post_ra>
